<compile_context>
chip_gen: v6e
topology: v6e:2x2x1
jax: 0.10.0
libtpu: 0.0.40
codegen_flags: <defaults>
</compile_context>

<pallas_src>
import functools

import jax
import jax.numpy as jnp
from jax.experimental import pallas as pl
from jax.experimental.pallas import tpu as pltpu


# ------------------------- chip-aware tiling config --------------------------

def _vmem_capacity_bytes():
    try:
        return int(pltpu.get_tpu_info().vmem_capacity_bytes)
    except Exception:
        return 64 * 1024 * 1024   # assume the smallest (v7x) if unknown


_PHYS_VMEM = _vmem_capacity_bytes()
_BIG_VMEM = _PHYS_VMEM >= 100 * 1024 * 1024       # v5e / v6e (128 MiB VMEM)

if _BIG_VMEM:
    _TM_CANDIDATES = (1024, 512, 256, 128)
    _TN_CANDIDATES = (2048, 1024, 512, 256, 128)
    _TK_CANDIDATES = (512, 256, 128)
    _VMEM_LIMIT = 96 * 1024 * 1024
else:                                              # v7x: 64 MiB per TC, 2 TCs
    _TM_CANDIDATES = (512, 256, 128)
    _TN_CANDIDATES = (1024, 512, 256, 128)
    _TK_CANDIDATES = (512, 256, 128)
    _VMEM_LIMIT = 44 * 1024 * 1024

# On v7x (2 TensorCores) prefer >= 2 tiles along M, the only parallel axis of
# the LoRA kernel, so both cores get work.
_PREFER_MULTI_M_TILES = not _BIG_VMEM


def _round_up(x, m):
    return ((x + m - 1) // m) * m


def _pick_tile(dim, candidates, prefer_multi=False):
    """Pick a tile size minimizing pad waste (<=10% tolerance, prefer bigger)."""
    dimp = _round_up(dim, 128)
    opts = [(min(c, dimp), _round_up(dimp, min(c, dimp))) for c in candidates]
    best_waste = min(p - dimp for _, p in opts)
    tol = max(best_waste, dimp // 10)
    viable = [(t, p) for t, p in opts if p - dimp <= tol]
    if prefer_multi:
        multi = [(t, p) for t, p in viable if p // t >= 2]
        if multi:
            viable = multi
    t = max(t for t, _ in viable)
    return t, _round_up(dimp, t)


def _pad2d(x, rows, cols):
    pr, pc = rows - x.shape[0], cols - x.shape[1]
    if pr or pc:
        x = jnp.pad(x, ((0, pr), (0, pc)))
    return x


# ------------------------------- Pallas kernels ------------------------------

def _lora_linear_kernel(x_ref, w_ref, b_ref, a_ref, bb_ref, o_ref,
                        acc_ref, xa_ref, *, tk, apply_relu):
    """Fused  y = x @ W + b + (x @ A) @ B_scaled  (optionally ReLU'd).

    Grid = (M tiles, N tiles, K tiles); K is the reduction axis.
    acc_ref: (tm, tn) f32 base accumulator.
    xa_ref : (tm, r_pad) f32 LoRA accumulator, computed only when j == 0 and
             reused (scratch persists across grid steps) for j > 0 tiles.
    a_ref  : (Kp, r_pad) fully VMEM-resident A, sliced per K tile.
    """
    j = pl.program_id(1)
    k = pl.program_id(2)

    @pl.when(k == 0)
    def _():
        acc_ref[...] = jnp.zeros_like(acc_ref)

    x = x_ref[...]
    acc_ref[...] += jnp.dot(x, w_ref[...], preferred_element_type=jnp.float32)

    @pl.when(jnp.logical_and(j == 0, k == 0))
    def _():
        xa_ref[...] = jnp.zeros_like(xa_ref)

    @pl.when(j == 0)
    def _():
        a_blk = a_ref[pl.ds(pl.multiple_of(k * tk, tk), tk), :]
        xa_ref[...] += jnp.dot(x, a_blk, preferred_element_type=jnp.float32)

    @pl.when(k == pl.num_programs(2) - 1)
    def _():
        # bf16 downcast of x@A before the tiny B matmul matches the reference;
        # keep in mind it trades a little precision for MXU-friendly operands.
        lora = jnp.dot(xa_ref[...].astype(bb_ref.dtype), bb_ref[...],
                       preferred_element_type=jnp.float32)
        y = acc_ref[...] + lora + b_ref[...]
        if apply_relu:
            y = jnp.maximum(y, 0.0)
        o_ref[...] = y.astype(o_ref.dtype)


def _plain_linear_kernel(x_ref, w_ref, b_ref, o_ref, acc_ref, *, apply_relu):
    """y = x @ W + b  (optionally ReLU'd), tiled over (M, N, K)."""
    k = pl.program_id(2)

    @pl.when(k == 0)
    def _():
        acc_ref[...] = jnp.zeros_like(acc_ref)

    acc_ref[...] += jnp.dot(x_ref[...], w_ref[...],
                            preferred_element_type=jnp.float32)

    @pl.when(k == pl.num_programs(2) - 1)
    def _():
        y = acc_ref[...] + b_ref[...]
        if apply_relu:
            y = jnp.maximum(y, 0.0)
        o_ref[...] = y.astype(o_ref.dtype)


# ------------------------- parameter preparation ----------------------------
# Weights are padded / cast ONCE (at model init), not per forward call.

def _prep_linear(w_f32, b_f32):
    """w: (K, N) f32, b: (1, N) f32 -> prepped dict (padded bf16 W, f32 bias)."""
    K, N = w_f32.shape
    tn, Np = _pick_tile(N, _TN_CANDIDATES)
    tk, Kp = _pick_tile(K, _TK_CANDIDATES)
    return {
        "N": N, "K": K, "Np": Np, "Kp": Kp, "tn": tn, "tk": tk,
        "w_pad": _pad2d(w_f32.astype(jnp.bfloat16), Kp, Np),
        "b_pad": _pad2d(b_f32.astype(jnp.float32), 1, Np),
        # unpadded copies kept for the pure-JAX reference / merged path
        "w_f32": w_f32, "w_bf16": w_f32.astype(jnp.bfloat16),
        "b_f32": b_f32.astype(jnp.float32),
    }


def _prep_lora(prep, A_f32, B_f32, scaling):
    r = A_f32.shape[1]
    rp = _round_up(r, 128)                        # lane-pad rank
    prep["rp"] = rp
    prep["A"] = A_f32
    prep["a_pad"] = _pad2d(A_f32.astype(jnp.bfloat16), prep["Kp"], rp)
    prep["A_bf16"] = A_f32.astype(jnp.bfloat16)
    _set_lora_B(prep, B_f32, scaling)


def _set_lora_B(prep, B_f32, scaling):
    prep["B"] = B_f32
    bs = (B_f32 * scaling).astype(jnp.bfloat16)   # scaling folded in once
    prep["B_scaled_bf16"] = bs
    prep["bb_pad"] = _pad2d(bs, prep["rp"], prep["Np"])


# ------------------------------ Python wrappers ------------------------------

def lora_linear(x, prep, *, apply_relu=False, out_dtype=jnp.float32):
    M, K = x.shape
    N, Np, Kp = prep["N"], prep["Np"], prep["Kp"]
    tn, tk, rp = prep["tn"], prep["tk"], prep["rp"]
    tm, Mp = _pick_tile(M, _TM_CANDIDATES, prefer_multi=_PREFER_MULTI_M_TILES)

    xp = x.astype(jnp.bfloat16)
    if (Mp, Kp) != (M, K):
        xp = jnp.pad(xp, ((0, Mp - M), (0, Kp - K)))

    grid = (Mp // tm, Np // tn, Kp // tk)
    out = pl.pallas_call(
        functools.partial(_lora_linear_kernel, tk=tk, apply_relu=apply_relu),
        out_shape=jax.ShapeDtypeStruct((Mp, Np), out_dtype),
        grid_spec=pltpu.PrefetchScalarGridSpec(
            num_scalar_prefetch=0,
            grid=grid,
            in_specs=[
                pl.BlockSpec((tm, tk), lambda i, j, k: (i, k)),    # x
                pl.BlockSpec((tk, tn), lambda i, j, k: (k, j)),    # W
                pl.BlockSpec((1, tn), lambda i, j, k: (0, j)),     # bias slice
                pl.BlockSpec((Kp, rp), lambda i, j, k: (0, 0)),    # A resident
                pl.BlockSpec((rp, tn), lambda i, j, k: (0, j)),    # B (scaled)
            ],
            out_specs=pl.BlockSpec((tm, tn), lambda i, j, k: (i, j)),
            scratch_shapes=[pltpu.VMEM((tm, tn), jnp.float32),
                            pltpu.VMEM((tm, rp), jnp.float32)],
        ),
        compiler_params=pltpu.CompilerParams(
            # N axis must NOT be megacore-sharded: the x@A scratch is filled
            # only on the j == 0 pass and reused for j > 0 on the same core.
            dimension_semantics=("parallel", "arbitrary", "arbitrary"),
            vmem_limit_bytes=_VMEM_LIMIT),
    )(xp, prep["w_pad"], prep["b_pad"], prep["a_pad"], prep["bb_pad"])
    if (Mp, Np) != (M, N):
        out = out[:M, :N]
    return out


def plain_linear(x, prep, *, apply_relu=False, out_dtype=jnp.float32):
    M, K = x.shape
    N, Np, Kp = prep["N"], prep["Np"], prep["Kp"]
    tn, tk = prep["tn"], prep["tk"]
    tm, Mp = _pick_tile(M, _TM_CANDIDATES, prefer_multi=_PREFER_MULTI_M_TILES)

    xp = x.astype(jnp.bfloat16)
    if (Mp, Kp) != (M, K):
        xp = jnp.pad(xp, ((0, Mp - M), (0, Kp - K)))

    grid = (Mp // tm, Np // tn, Kp // tk)
    out = pl.pallas_call(
        functools.partial(_plain_linear_kernel, apply_relu=apply_relu),
        out_shape=jax.ShapeDtypeStruct((Mp, Np), out_dtype),
        grid_spec=pltpu.PrefetchScalarGridSpec(
            num_scalar_prefetch=0,
            grid=grid,
            in_specs=[
                pl.BlockSpec((tm, tk), lambda i, j, k: (i, k)),
                pl.BlockSpec((tk, tn), lambda i, j, k: (k, j)),
                pl.BlockSpec((1, tn), lambda i, j, k: (0, j)),
            ],
            out_specs=pl.BlockSpec((tm, tn), lambda i, j, k: (i, j)),
            scratch_shapes=[pltpu.VMEM((tm, tn), jnp.float32)],
        ),
        compiler_params=pltpu.CompilerParams(
            dimension_semantics=("parallel", "parallel", "arbitrary"),
            vmem_limit_bytes=_VMEM_LIMIT),
    )(xp, prep["w_pad"], prep["b_pad"])
    if (Mp, Np) != (M, N):
        out = out[:M, :N]
    return out


# --------------------------- LoraModel (JAX version) -------------------------

class LoraConfig:
    def __init__(self, rank, alpha, target_modules):
        self.lora_r_ = rank
        self.lora_alpha_ = alpha
        self.target_modules_ = target_modules


class LoraModel:
    """Mirrors LoraModel: replaces targeted linear layers with LoRA layers and
    runs the base model forward. Base model here is a small 2-layer MLP
    (fc1 -> ReLU -> fc2). Base weights are frozen; only inference forward is
    kernelized."""

    def __init__(self, base_params, config: LoraConfig, key):
        self.config = config
        self.scaling = config.lora_alpha_ / config.lora_r_

        self.layers = {}       # layer name -> prepped (padded) params
        self.lora_names = set()
        replaced = 0
        layer_names = sorted({n[:-len(".weight")] for n in base_params
                              if n.endswith(".weight")})
        for lname in layer_names:
            w = base_params[lname + ".weight"].astype(jnp.float32)   # (in, out)
            b = base_params[lname + ".bias"].astype(jnp.float32).reshape(1, -1)
            prep = _prep_linear(w, b)
            if any(pat in lname for pat in config.target_modules_):
                key, ka = jax.random.split(key)
                k_in, _ = w.shape
                r = config.lora_r_
                # LoRA init: A ~ N(0, 1/r), B = 0
                # TODO(synk): PyTorch uses kaiming-uniform for A; numerically
                # benign here (B starts at 0), but not a faithful init port.
                A = jax.random.normal(ka, (k_in, r), jnp.float32) / r
                B = jnp.zeros((r, prep["N"]), jnp.float32)
                _prep_lora(prep, A, B, self.scaling)
                self.lora_names.add(lname)
                replaced += 1
            self.layers[lname] = prep
        print(f"replaced {replaced} layers with LoRA layers")

    def set_lora_B(self, name, B):
        _set_lora_B(self.layers[name], B, self.scaling)

    def _apply_linear(self, name, x, apply_relu, out_dtype):
        prep = self.layers[name]
        if name in self.lora_names:
            return lora_linear(x, prep, apply_relu=apply_relu,
                               out_dtype=out_dtype)
        return plain_linear(x, prep, apply_relu=apply_relu, out_dtype=out_dtype)

    def forward(self, x):
        # base_model forward: fc1 -> relu -> fc2.  ReLU fused into fc1's
        # epilogue; the (M, inter) intermediate stays bf16.
        # TODO(synk): fc1->ReLU->fc2 could be fused into one pallas_call via an
        # outer M-tile pipeline to avoid the intermediate HBM round trip.
        h = self._apply_linear("fc1", x, apply_relu=True, out_dtype=jnp.bfloat16)
        return self._apply_linear("fc2", h, apply_relu=False,
                                  out_dtype=jnp.float32)

    # Merged-weight serving path: W' = W + scaling * A @ B, plain kernel only.
    def merged_preps(self):
        merged = {}
        for name, prep in self.layers.items():
            wf = prep["w_f32"]
            if name in self.lora_names:
                wf = wf + self.scaling * (prep["A"] @ prep["B"])
            merged[name] = _prep_linear(wf, prep["b_f32"])
        return merged

    def forward_merged(self, x):
        p = self.merged_preps()
        h = plain_linear(x, p["fc1"], apply_relu=True, out_dtype=jnp.bfloat16)
        return plain_linear(h, p["fc2"], apply_relu=False, out_dtype=jnp.float32)

    # pure-JAX reference (no Pallas), same bf16/f32 arithmetic as the kernels
    def forward_ref(self, x):
        def lin(name, x, relu, out_dtype):
            prep = self.layers[name]
            xb = x.astype(jnp.bfloat16)
            y = jnp.dot(xb, prep["w_bf16"],
                        preferred_element_type=jnp.float32) + prep["b_f32"]
            if name in self.lora_names:
                xa = jnp.dot(xb, prep["A_bf16"],
                             preferred_element_type=jnp.float32)
                y = y + jnp.dot(xa.astype(jnp.bfloat16), prep["B_scaled_bf16"],
                                preferred_element_type=jnp.float32)
            if relu:
                y = jnp.maximum(y, 0.0)
            return y.astype(out_dtype)

        h = lin("fc1", x, True, jnp.bfloat16)
        return lin("fc2", h, False, jnp.float32)

    def forward_merged_ref(self, x):
        p = self.merged_preps()

        def lin(name, x, relu, out_dtype):
            y = jnp.dot(x.astype(jnp.bfloat16), p[name]["w_bf16"],
                        preferred_element_type=jnp.float32) + p[name]["b_f32"]
            if relu:
                y = jnp.maximum(y, 0.0)
            return y.astype(out_dtype)

        h = lin("fc1", x, True, jnp.bfloat16)
        return lin("fc2", h, False, jnp.float32)


# ------------------------------------ main -----------------------------------

if __name__ == "__main__":
    key = jax.random.PRNGKey(0)
    batch, seq, hidden, inter = 2, 8, 32, 64
    rank, alpha = 4, 8.0

    k_x, k_w1, k_b1, k_w2, k_b2, k_lora, k_bpert = jax.random.split(key, 7)

    # Base model params, stored as (in_features, out_features).
    base_params = {
        "fc1.weight": jax.random.normal(k_w1, (hidden, inter), jnp.float32) * 0.05,
        "fc1.bias": jax.random.normal(k_b1, (1, inter), jnp.float32) * 0.01,
        "fc2.weight": jax.random.normal(k_w2, (inter, hidden), jnp.float32) * 0.05,
        "fc2.bias": jax.random.normal(k_b2, (1, hidden), jnp.float32) * 0.01,
    }

    config = LoraConfig(rank=rank, alpha=alpha, target_modules=["fc1", "fc2"])
    model = LoraModel(base_params, config, k_lora)

    # Make lora_B nonzero so the low-rank path actually contributes
    # (standard LoRA inits B to zero; perturb deterministically for testing).
    for name in sorted(model.lora_names):
        k_bpert, sub = jax.random.split(k_bpert)
        shape = model.layers[name]["B"].shape
        model.set_lora_B(name, jax.random.normal(sub, shape, jnp.float32) * 0.1)

    # input: (batch, seq, hidden) flattened to (M, hidden) for the kernels
    x = jax.random.normal(k_x, (batch, seq, hidden), jnp.float32)
    x2d = x.reshape(batch * seq, hidden)

    out = jax.block_until_ready(model.forward(x2d))
    ref = model.forward_ref(x2d)
    assert out.shape == (batch * seq, hidden)
    assert jnp.allclose(out, ref, atol=5e-3, rtol=5e-3), "mismatch vs reference"

    # merged-weight inference path (plain kernel only)
    out_m = jax.block_until_ready(model.forward_merged(x2d))
    ref_m = model.forward_merged_ref(x2d)
    assert jnp.allclose(out_m, ref_m, atol=5e-3, rtol=5e-3), "merged mismatch"

    # TODO(synk): training-mode bookkeeping (requires_grad toggling, train/eval
    # flags, DoRA magnitude vector) has no Pallas equivalent; only the
    # inference forward is kernelized.
    print("KERNEL_OK")
</pallas_src>

<mosaic_0001>
module attributes {stable_mosaic.version = 11 : i64} {
  func.func @_lora_linear_kernel(%arg0: i32, %arg1: i32, %arg2: i32, %arg3: memref<128x128xbf16, #tpu.memory_space<vmem>>, %arg4: memref<128x128xbf16, #tpu.memory_space<vmem>>, %arg5: memref<1x128xf32, #tpu.memory_space<vmem>>, %arg6: memref<128x128xbf16, #tpu.memory_space<vmem>>, %arg7: memref<128x128xbf16, #tpu.memory_space<vmem>>, %arg8: memref<128x128xbf16, #tpu.memory_space<vmem>>, %arg9: memref<128x128xf32, #tpu.memory_space<vmem>>, %arg10: memref<128x128xf32, #tpu.memory_space<vmem>>) attributes {dimension_semantics = [#tpu.dimension_semantics<parallel>, #tpu.dimension_semantics<arbitrary>, #tpu.dimension_semantics<arbitrary>], iteration_bounds = array<i64: 1, 1, 1>, scalar_prefetch = 0 : i64, scratch_operands = 2 : i64, tpu.core_type = #tpu.core_type<tc>, window_params = [{transform_indices = @transform_0, window_bounds = array<i64: 128, 128>}, {transform_indices = @transform_1, window_bounds = array<i64: 128, 128>}, {transform_indices = @transform_2, window_bounds = array<i64: 1, 128>}, {pipeline_mode = #tpu.pipeline_mode<synchronous>, transform_indices = @transform_3, window_bounds = array<i64: 128, 128>}, {transform_indices = @transform_4, window_bounds = array<i64: 128, 128>}, {transform_indices = @transform_5, window_bounds = array<i64: 128, 128>}]} {
    %c0_i32 = arith.constant 0 : i32
    %0 = arith.cmpi eq, %arg2, %c0_i32 : i32
    %1 = arith.extui %0 : i1 to i32
    %c0_i32_0 = arith.constant 0 : i32
    %2 = arith.cmpi ne, %1, %c0_i32_0 : i32
    scf.if %2 {
      %cst_15 = arith.constant 0.000000e+00 : f32
      %20 = vector.broadcast %cst_15 : f32 to vector<128x128xf32>
      %c0_16 = arith.constant 0 : index
      %c0_17 = arith.constant 0 : index
      %21 = vector.load %arg9[%c0_16, %c0_17] : memref<128x128xf32, #tpu.memory_space<vmem>>, vector<128x128xf32>
      tpu.vector_store %arg9[%c0_16, %c0_17], %20 {strides = array<i32>} : memref<128x128xf32, #tpu.memory_space<vmem>>, vector<128x128xf32>,
    } else {
    }
    %c0 = arith.constant 0 : index
    %c0_1 = arith.constant 0 : index
    %3 = vector.load %arg3[%c0, %c0_1] : memref<128x128xbf16, #tpu.memory_space<vmem>>, vector<128x128xbf16>
    %c0_2 = arith.constant 0 : index
    %c0_3 = arith.constant 0 : index
    %4 = vector.load %arg9[%c0_2, %c0_3] : memref<128x128xf32, #tpu.memory_space<vmem>>, vector<128x128xf32>
    %c0_4 = arith.constant 0 : index
    %c0_5 = arith.constant 0 : index
    %5 = vector.load %arg4[%c0_4, %c0_5] : memref<128x128xbf16, #tpu.memory_space<vmem>>, vector<128x128xbf16>
    %cst = arith.constant dense<0.000000e+00> : vector<128x128xf32>
    %6 = tpu.matmul %3, %5, %cst {dimension_numbers = #tpu.dot_dimension_numbers<[1], [0], [0], [1], [0, 0, 1, 1], [], []>} : vector<128x128xbf16>, vector<128x128xbf16>, vector<128x128xf32> -> vector<128x128xf32>
    %7 = arith.addf %4, %6 : vector<128x128xf32>
    %c0_6 = arith.constant 0 : index
    %c0_7 = arith.constant 0 : index
    %8 = vector.load %arg9[%c0_6, %c0_7] : memref<128x128xf32, #tpu.memory_space<vmem>>, vector<128x128xf32>
    tpu.vector_store %arg9[%c0_6, %c0_7], %7 {strides = array<i32>} : memref<128x128xf32, #tpu.memory_space<vmem>>, vector<128x128xf32>,
    %c0_i32_8 = arith.constant 0 : i32
    %9 = arith.cmpi eq, %arg1, %c0_i32_8 : i32
    %c0_i32_9 = arith.constant 0 : i32
    %10 = arith.cmpi eq, %arg2, %c0_i32_9 : i32
    %11 = arith.andi %9, %10 : i1
    %12 = arith.extui %11 : i1 to i32
    %c0_i32_10 = arith.constant 0 : i32
    %13 = arith.cmpi ne, %12, %c0_i32_10 : i32
    scf.if %13 {
      %cst_15 = arith.constant 0.000000e+00 : f32
      %20 = vector.broadcast %cst_15 : f32 to vector<128x128xf32>
      %c0_16 = arith.constant 0 : index
      %c0_17 = arith.constant 0 : index
      %21 = vector.load %arg10[%c0_16, %c0_17] : memref<128x128xf32, #tpu.memory_space<vmem>>, vector<128x128xf32>
      tpu.vector_store %arg10[%c0_16, %c0_17], %20 {strides = array<i32>} : memref<128x128xf32, #tpu.memory_space<vmem>>, vector<128x128xf32>,
    } else {
    }
    %c0_i32_11 = arith.constant 0 : i32
    %14 = arith.cmpi eq, %arg1, %c0_i32_11 : i32
    %15 = arith.extui %14 : i1 to i32
    %c0_i32_12 = arith.constant 0 : i32
    %16 = arith.cmpi ne, %15, %c0_i32_12 : i32
    scf.if %16 {
      %c128_i32 = arith.constant 128 : i32
      %20 = arith.muli %arg2, %c128_i32 : i32
      %21 = tpu.assume_multiple %20, 128 : i32
      %22 = arith.index_cast %21 : i32 to index
      %c0_15 = arith.constant 0 : index
      %23 = vector.load %arg6[%22, %c0_15] : memref<128x128xbf16, #tpu.memory_space<vmem>>, vector<128x128xbf16>
      %c0_16 = arith.constant 0 : index
      %c0_17 = arith.constant 0 : index
      %24 = vector.load %arg10[%c0_16, %c0_17] : memref<128x128xf32, #tpu.memory_space<vmem>>, vector<128x128xf32>
      %cst_18 = arith.constant dense<0.000000e+00> : vector<128x128xf32>
      %25 = tpu.matmul %3, %23, %cst_18 {dimension_numbers = #tpu.dot_dimension_numbers<[1], [0], [0], [1], [0, 0, 1, 1], [], []>} : vector<128x128xbf16>, vector<128x128xbf16>, vector<128x128xf32> -> vector<128x128xf32>
      %26 = arith.addf %24, %25 : vector<128x128xf32>
      %c0_19 = arith.constant 0 : index
      %c0_20 = arith.constant 0 : index
      %27 = vector.load %arg10[%c0_19, %c0_20] : memref<128x128xf32, #tpu.memory_space<vmem>>, vector<128x128xf32>
      tpu.vector_store %arg10[%c0_19, %c0_20], %26 {strides = array<i32>} : memref<128x128xf32, #tpu.memory_space<vmem>>, vector<128x128xf32>,
    } else {
    }
    %c0_i32_13 = arith.constant 0 : i32
    %17 = arith.cmpi eq, %arg2, %c0_i32_13 : i32
    %18 = arith.extui %17 : i1 to i32
    %c0_i32_14 = arith.constant 0 : i32
    %19 = arith.cmpi ne, %18, %c0_i32_14 : i32
    scf.if %19 {
      %c0_15 = arith.constant 0 : index
      %c0_16 = arith.constant 0 : index
      %20 = vector.load %arg10[%c0_15, %c0_16] : memref<128x128xf32, #tpu.memory_space<vmem>>, vector<128x128xf32>
      %21 = arith.truncf %20 : vector<128x128xf32> to vector<128x128xbf16>
      %c0_17 = arith.constant 0 : index
      %c0_18 = arith.constant 0 : index
      %22 = vector.load %arg7[%c0_17, %c0_18] : memref<128x128xbf16, #tpu.memory_space<vmem>>, vector<128x128xbf16>
      %cst_19 = arith.constant dense<0.000000e+00> : vector<128x128xf32>
      %23 = tpu.matmul %21, %22, %cst_19 {dimension_numbers = #tpu.dot_dimension_numbers<[1], [0], [0], [1], [0, 0, 1, 1], [], []>} : vector<128x128xbf16>, vector<128x128xbf16>, vector<128x128xf32> -> vector<128x128xf32>
      %c0_20 = arith.constant 0 : index
      %c0_21 = arith.constant 0 : index
      %24 = vector.load %arg9[%c0_20, %c0_21] : memref<128x128xf32, #tpu.memory_space<vmem>>, vector<128x128xf32>
      %25 = arith.addf %24, %23 : vector<128x128xf32>
      %c0_22 = arith.constant 0 : index
      %c0_23 = arith.constant 0 : index
      %26 = vector.load %arg5[%c0_22, %c0_23] : memref<1x128xf32, #tpu.memory_space<vmem>>, vector<1x128xf32>
      %27 = vector.broadcast %26 : vector<1x128xf32> to vector<128x128xf32>
      %28 = arith.addf %25, %27 : vector<128x128xf32>
      %cst_24 = arith.constant 0.000000e+00 : f32
      %29 = vector.broadcast %cst_24 : f32 to vector<128x128xf32>
      %30 = arith.maximumf %28, %29 : vector<128x128xf32>
      %31 = arith.truncf %30 : vector<128x128xf32> to vector<128x128xbf16>
      %c0_25 = arith.constant 0 : index
      %c0_26 = arith.constant 0 : index
      %32 = vector.load %arg8[%c0_25, %c0_26] : memref<128x128xbf16, #tpu.memory_space<vmem>>, vector<128x128xbf16>
      tpu.vector_store %arg8[%c0_25, %c0_26], %31 {strides = array<i32>} : memref<128x128xbf16, #tpu.memory_space<vmem>>, vector<128x128xbf16>,
    } else {
    }
    return
  }
  func.func @transform_0(%arg0: i32, %arg1: i32, %arg2: i32) -> (i32, i32) {
    %c0_i32 = arith.constant 0 : i32
    return %arg0, %arg2 : i32, i32
  }
  func.func @transform_1(%arg0: i32, %arg1: i32, %arg2: i32) -> (i32, i32) {
    %c0_i32 = arith.constant 0 : i32
    return %arg2, %arg1 : i32, i32
  }
  func.func @transform_2(%arg0: i32, %arg1: i32, %arg2: i32) -> (i32, i32) {
    %c0_i32 = arith.constant 0 : i32
    %c0_i32_0 = arith.constant 0 : i32
    return %c0_i32, %arg1 : i32, i32
  }
  func.func @transform_3(%arg0: i32, %arg1: i32, %arg2: i32) -> (i32, i32) {
    %c0_i32 = arith.constant 0 : i32
    %c0_i32_0 = arith.constant 0 : i32
    %c0_i32_1 = arith.constant 0 : i32
    return %c0_i32, %c0_i32_0 : i32, i32
  }
  func.func @transform_4(%arg0: i32, %arg1: i32, %arg2: i32) -> (i32, i32) {
    %c0_i32 = arith.constant 0 : i32
    %c0_i32_0 = arith.constant 0 : i32
    return %c0_i32, %arg1 : i32, i32
  }
  func.func @transform_5(%arg0: i32, %arg1: i32, %arg2: i32) -> (i32, i32) {
    %c0_i32 = arith.constant 0 : i32
    return %arg0, %arg1 : i32, i32
  }
}

</mosaic_0001>

<bundles_post_ra>
// kernel: tpu_custom_call.1
= control target key start
LH: loop header
LB: loop body
LE: loop exit
PB: predicated region body
PF: predicated region fallthrough
CT: control target
= control target key end

     0   :  { %10 = vsyncpa [#allocation5], 0  ;;  %s1484_s0 = inlined_call_operand.hbm [shape: bf16[128,128], index: 0, kind: input, shape index: {}]   ;;  %s1485_s1 = inlined_call_operand.hbm [shape: bf16[128,128], index: 1, kind: input, shape index: {}]   ;;  %s1486_s2 = inlined_call_operand.vmem [shape: f32[1,128], index: 2, kind: input, shape index: {}]   ;;  %s1487_s3 = inlined_call_operand.hbm [shape: bf16[128,128], index: 3, kind: input, shape index: {}]   ;;  %s1488_s4 = inlined_call_operand.hbm [shape: bf16[128,128], index: 4, kind: input, shape index: {}]   ;;  %s1489_s5 = inlined_call_operand.hbm [shape: bf16[128,128], index: 5, kind: output, shape index: {}]  }
   0x1   :  { %11 = vsyncpa [#allocation8], 0 }
   0x2   :  { %12 = vsyncpa [#allocation11], 0 }
   0x3   :  { %13 = vsyncpa [#allocation6], 0  ;;  %s1387_s18 = smov [#allocation7]   ;;  %s1388_s20 = smov [#allocation4]  }
   0x4   :  { %s31_s19 = sshll.u32 %s1387_s18, 4  ;;  %s19_s21 = sshll.u32 %s1388_s20, 4  ;;  %s32_s19 = int_to_ptr.vmem [resolvable:$true] %s31_s19  ;;  %s20_s21 = int_to_ptr.vmem [resolvable:$true] %s19_s21 }
   0x5   :  { %s1287_s22 = scalar_lea.vmem %s32_s19, 1024  ;;  %p1292_p1 = scmp.lt.s32.totalorder %s32_s19, %s32_s19 }
   0x6   :  { %p1288_p0 = scmp.ne.s32.totalorder %s32_s19, %s1287_s22  ;;  %p1293_p2 = scmp.lt.s32.totalorder %s1287_s22, %s1287_s22 }
   0x8   :  { %p1294_p3 = por %p1293_p2, %p1292_p1 }
   0xa   :  { %p1295_p4 = pnand %p1294_p3, %p1288_p0 }
   0xc   :  { %1298 = shalt.err (!%p1295_p4)
}
   0xd   :  { %s1389_s23 = smov 64   ;;  %s1390_s24 = smov 4  }
   0xe   :  { %37 = dma.hbm_to_vmem [thread:$0]  %s1485_s1, 1024, %s32_s19, [#allocation8], %s1389_s23, %s1389_s23, %s1390_s24  }
   0xf   :  { %s1307_s27 = scalar_lea.vmem %s20_s21, 1024  ;;  %p1312_p6 = scmp.lt.s32.totalorder %s20_s21, %s20_s21 }
  0x10   :  { %p1308_p5 = scmp.ne.s32.totalorder %s20_s21, %s1307_s27  ;;  %p1313_p7 = scmp.lt.s32.totalorder %s1307_s27, %s1307_s27 }
  0x12   :  { %p1314_p8 = por %p1313_p7, %p1312_p6 }
  0x14   :  { %p1315_p9 = pnand %p1314_p8, %p1308_p5 }
  0x16   :  { %1318 = shalt.err (!%p1315_p9)
}
  0x17   :  { %25 = dma.hbm_to_vmem [thread:$0]  %s1484_s0, 1024, %s20_s21, [#allocation5], %s1389_s23, %s1389_s23, %s1390_s24  }
  0x18   :  { %s1391_s30 = smov [#allocation9]   ;;  %s1392_s7 = smov [#allocation10]  }
  0x19   :  { %s45_s6 = sshll.u32 %s1391_s30, 4  ;;  %s57_s8 = sshll.u32 %s1392_s7, 4  ;;  %s46_s6 = int_to_ptr.vmem [resolvable:$true] %s45_s6  ;;  %s58_s8 = int_to_ptr.vmem [resolvable:$true] %s57_s8 }
  0x1a   :  { %s1327_s1 = scalar_lea.vmem %s46_s6, 1024  ;;  %p1332_p11 = scmp.lt.s32.totalorder %s46_s6, %s46_s6 }
  0x1b   :  { %p1328_p10 = scmp.ne.s32.totalorder %s46_s6, %s1327_s1  ;;  %p1333_p12 = scmp.lt.s32.totalorder %s1327_s1, %s1327_s1 }
  0x1d   :  { %p1334_p13 = por %p1333_p12, %p1332_p11 }
  0x1f   :  { %p1335_p0 = pnand %p1334_p13, %p1328_p10 }
  0x21   :  { %1338 = shalt.err (!%p1335_p0)
}
  0x22   :  { %51 = dma.hbm_to_vmem [thread:$0]  %s1487_s3, 1024, %s46_s6, [#allocation8], %s1389_s23, %s1389_s23, %s1390_s24  }
  0x23   :  { %s1347_s0 = scalar_lea.vmem %s58_s8, 1024  ;;  %p1352_p2 = scmp.lt.s32.totalorder %s58_s8, %s58_s8 }
  0x24   :  { %p1348_p1 = scmp.ne.s32.totalorder %s58_s8, %s1347_s0  ;;  %p1353_p3 = scmp.lt.s32.totalorder %s1347_s0, %s1347_s0 }
  0x26   :  { %p1354_p4 = por %p1353_p3, %p1352_p2 }
  0x28   :  { %p1355_p5 = pnand %p1354_p4, %p1348_p1 }
  0x2a   :  { %1358 = shalt.err (!%p1355_p5)
}
  0x2b   :  { %63 = dma.hbm_to_vmem [thread:$0]  %s1488_s4, 1024, %s58_s8, [#allocation11], %s1389_s23, %s1389_s23, %s1390_s24  }
  0x2c   :  { %1379 = dma.done.wait [#allocation5], 1024  }
  0x2d   :  { %1380 = vsyncadd [#allocation5], 4294966272 }
  0x2e   :  { %1381 = dma.done.wait [#allocation8], 2048  }
  0x2f   :  { %1382 = vsyncadd [#allocation8], 4294965248 }
  0x30   :  { %1383 = dma.done.wait [#allocation11], 1024  }
  0x31   :  { %1384 = vsyncadd [#allocation11], 4294966272  ;;  %v1247_v0 = vld [vmem:[#allocation9 + $0x38] sm:$0xff]   ;;  %v1248_v1 = vld [vmem:[#allocation9 + $0x30] sm:$0xff]  }
  0x32   :  { %1160 = vmatprep.subr.bf16.mxu1 %v1247_v0  ;;  %v1249_v2 = vld [vmem:[#allocation9 + $0x28] sm:$0xff]   ;;  %v1250_v3 = vld [vmem:[#allocation9 + $0x20] sm:$0xff]   ;;  %v1251_v5 = vld [vmem:[#allocation9 + $0x18] sm:$0xff]  }
  0x33   :  { %1161 = vmatpush3.bf16.msra.mxu1 %v1247_v0  ;;  %v1255_v4 = vld [vmem:[#allocation4] sm:$0xff]   ;;  %v1252_v6 = vld [vmem:[#allocation9 + $0x10] sm:$0xff]   ;;  %v1263_v7 = vld [vmem:[#allocation7 + $0x38] sm:$0xff]  }
  0x34   :  { %1162 = vmatprep.subr.bf16.mxu1 %v1248_v1  ;;  %1176 = vmatprep.mubr.bf16.mxu1 %v1255_v4  ;;  %v1264_v8 = vld [vmem:[#allocation7 + $0x30] sm:$0xff]   ;;  %v1253_v9 = vld [vmem:[#allocation9 + $0x8] sm:$0xff]   ;;  %v1254_v11 = vld [vmem:[#allocation9] sm:$0xff]  }
  0x35   :  { %1144 = vmatprep.mubr.bf16.mxu0 %v1255_v4  ;;  %1128 = vmatprep.subr.bf16.mxu0 %v1263_v7  ;;  %v1265_v10 = vld [vmem:[#allocation7 + $0x28] sm:$0xff]   ;;  %v1266_v12 = vld [vmem:[#allocation7 + $0x20] sm:$0xff]   ;;  %v1267_v14 = vld [vmem:[#allocation7 + $0x18] sm:$0xff]  }
  0x36   :  { %1129 = vmatpush3.bf16.msra.mxu0 %v1263_v7  ;;  %v1256_v13 = vld [vmem:[#allocation4 + $0x8] sm:$0xff]   ;;  %v1271_v15 = vld [vmem:[#allocation10 + $0x38] sm:$0xff]   ;;  %v1257_v16 = vld [vmem:[#allocation4 + $0x10] sm:$0xff]  }
  0x37   :  { %1163 = vmatpush3.bf16.msra.mxu1 %v1248_v1  ;;  %1130 = vmatprep.subr.bf16.mxu0 %v1264_v8  ;;  %v1268_v17 = vld [vmem:[#allocation7 + $0x10] sm:$0xff]   ;;  %v1269_v19 = vld [vmem:[#allocation7 + $0x8] sm:$0xff]   ;;  %v1258_v20 = vld [vmem:[#allocation4 + $0x18] sm:$0xff]  }
  0x38   :  { %1164 = vmatprep.subr.bf16.mxu1 %v1249_v2  ;;  %v1272_v18 = vld [vmem:[#allocation10 + $0x30] sm:$0xff]   ;;  %v1259_v21 = vld [vmem:[#allocation4 + $0x20] sm:$0xff]   ;;  %v1273_v22 = vld [vmem:[#allocation10 + $0x28] sm:$0xff]  }
  0x39   :  { %v1270_v23 = vld [vmem:[#allocation7] sm:$0xff]   ;;  %v1260_v25 = vld [vmem:[#allocation4 + $0x28] sm:$0xff]   ;;  %v1261_v26 = vld [vmem:[#allocation4 + $0x30] sm:$0xff]  }
  0x3a   :  { %1131 = vmatpush3.bf16.msra.mxu0 %v1264_v8  ;;  %v1274_v24 = vld [vmem:[#allocation10 + $0x20] sm:$0xff]   ;;  %v1275_v27 = vld [vmem:[#allocation10 + $0x18] sm:$0xff]   ;;  %v1276_v28 = vld [vmem:[#allocation10 + $0x10] sm:$0xff]  }
  0x3b   :  { %1165 = vmatpush3.bf16.msra.mxu1 %v1249_v2  ;;  %1132 = vmatprep.subr.bf16.mxu0 %v1265_v10  ;;  %v1262_v29 = vld [vmem:[#allocation4 + $0x38] sm:$0xff]   ;;  %v1277_v30 = vld [vmem:[#allocation10 + $0x8] sm:$0xff]   ;;  %v1278_v31 = vld [vmem:[#allocation10] sm:$0xff]  }
  0x3c   :  { %1166 = vmatprep.subr.bf16.mxu1 %v1250_v3 }
  0x3e   :  { %1133 = vmatpush3.bf16.msra.mxu0 %v1265_v10  ;;  %v1457_v10 = vld [vmem:[%s1486_s2] ss:$0 sm:$0xff]  ;;  %s1393_s2 = smov [#allocation12]  }
  0x3f   :  { %1167 = vmatpush3.bf16.msra.mxu1 %v1250_v3  ;;  %1134 = vmatprep.subr.bf16.mxu0 %v1266_v12  ;;  %s952_s13 = sshll.u32 %s1393_s2, 4  ;;  %s953_s13 = int_to_ptr.vmem [resolvable:$true] %s952_s13 }
  0x40   :  { %1168 = vmatprep.subr.bf16.mxu1 %v1251_v5  ;;  %s1359_s14 = scalar_lea.vmem %s953_s13, 1024  ;;  %p1364_p7 = scmp.lt.s32.totalorder %s953_s13, %s953_s13 }
  0x41   :  { %p1360_p6 = scmp.ne.s32.totalorder %s953_s13, %s1359_s14  ;;  %p1365_p8 = scmp.lt.s32.totalorder %s1359_s14, %s1359_s14 }
  0x42   :  { %1135 = vmatpush3.bf16.msra.mxu0 %v1266_v12 }
  0x43   :  { %1169 = vmatpush3.bf16.msra.mxu1 %v1251_v5  ;;  %1136 = vmatprep.subr.bf16.mxu0 %v1267_v14  ;;  %p1366_p9 = por %p1365_p8, %p1364_p7 }
  0x44   :  { %1170 = vmatprep.subr.bf16.mxu1 %v1252_v6 }
  0x45   :  { %p1367_p10 = pnand %p1366_p9, %p1360_p6 }
  0x46   :  { %1137 = vmatpush3.bf16.msra.mxu0 %v1267_v14 }
  0x47   :  { %1171 = vmatpush3.bf16.msra.mxu1 %v1252_v6  ;;  %1138 = vmatprep.subr.bf16.mxu0 %v1268_v17 }
  0x48   :  { %1172 = vmatprep.subr.bf16.mxu1 %v1253_v9 }
  0x4a   :  { %1139 = vmatpush3.bf16.msra.mxu0 %v1268_v17 }
  0x4b   :  { %1173 = vmatpush3.bf16.msra.mxu1 %v1253_v9  ;;  %1140 = vmatprep.subr.bf16.mxu0 %v1269_v19 }
  0x4c   :  { %1174 = vmatprep.subr.bf16.mxu1 %v1254_v11 }
  0x4e   :  { %1141 = vmatpush3.bf16.msra.mxu0 %v1269_v19 }
  0x4f   :  { %1175 = vmatpush3.bf16.msra.mxu1 %v1254_v11  ;;  %1142 = vmatprep.subr.bf16.mxu0 %v1270_v23 }
  0x50   :  { %1224 = vmatprep.subr.bf16.mxu1 %v1271_v15 }
  0x52   :  { %1177 = vmatmul.mubr.bf16.vlgmr.msra.gmra.mxu1 %v1256_v13  ;;  %1143 = vmatpush3.bf16.msra.mxu0 %v1270_v23 }
  0x53   :  { %1180 = vmatprep.mubr.bf16.mxu1 %v1257_v16  ;;  %1232 = vmatpush3.bf16.msra.mxu1 %v1271_v15 }
  0x54   :  { %1225 = vmatprep.subr.bf16.mxu1 %v1272_v18  ;;  %1192 = vmatprep.subr.bf16.mxu0 %v1271_v15 }
  0x55   :  { %1145 = vmatmul.mubr.bf16.vlgmr.msra.gmra.mxu0 %v1256_v13 }
  0x56   :  { %1193 = vmatpush3.bf16.msra.mxu0 %v1271_v15  ;;  %1148 = vmatprep.mubr.bf16.mxu0 %v1257_v16 }
  0x57   :  { %1233 = vmatpush3.bf16.msra.mxu1 %v1272_v18  ;;  %1194 = vmatprep.subr.bf16.mxu0 %v1272_v18 }
  0x58   :  { %1226 = vmatprep.subr.bf16.mxu1 %v1273_v22 }
  0x5a   :  { %1181 = vmatmul.mubr.bf16.gmra.mxu1 %v1258_v20  ;;  %1195 = vmatpush3.bf16.msra.mxu0 %v1272_v18 }
  0x5b   :  { %1184 = vmatprep.mubr.bf16.mxu1 %v1259_v21  ;;  %1234 = vmatpush3.bf16.msra.mxu1 %v1273_v22 }
  0x5c   :  { %1227 = vmatprep.subr.bf16.mxu1 %v1274_v24  ;;  %1196 = vmatprep.subr.bf16.mxu0 %v1273_v22 }
  0x5d   :  { %1149 = vmatmul.mubr.bf16.gmra.mxu0 %v1258_v20 }
  0x5e   :  { %1197 = vmatpush3.bf16.msra.mxu0 %v1273_v22  ;;  %1152 = vmatprep.mubr.bf16.mxu0 %v1259_v21 }
  0x5f   :  { %1235 = vmatpush3.bf16.msra.mxu1 %v1274_v24  ;;  %1198 = vmatprep.subr.bf16.mxu0 %v1274_v24 }
  0x60   :  { %1228 = vmatprep.subr.bf16.mxu1 %v1275_v27 }
  0x62   :  { %1185 = vmatmul.mubr.bf16.gmra.mxu1 %v1260_v25  ;;  %1199 = vmatpush3.bf16.msra.mxu0 %v1274_v24 }
  0x63   :  { %1188 = vmatprep.mubr.bf16.mxu1 %v1261_v26  ;;  %1236 = vmatpush3.bf16.msra.mxu1 %v1275_v27 }
  0x64   :  { %1229 = vmatprep.subr.bf16.mxu1 %v1276_v28  ;;  %1200 = vmatprep.subr.bf16.mxu0 %v1275_v27 }
  0x65   :  { %1153 = vmatmul.mubr.bf16.gmra.mxu0 %v1260_v25 }
  0x66   :  { %1201 = vmatpush3.bf16.msra.mxu0 %v1275_v27  ;;  %1156 = vmatprep.mubr.bf16.mxu0 %v1261_v26 }
  0x67   :  { %1237 = vmatpush3.bf16.msra.mxu1 %v1276_v28  ;;  %1202 = vmatprep.subr.bf16.mxu0 %v1276_v28 }
  0x68   :  { %1230 = vmatprep.subr.bf16.mxu1 %v1277_v30 }
  0x6a   :  { %1189 = vmatmul.mubr.bf16.gmra.mxu1 %v1262_v29  ;;  %1203 = vmatpush3.bf16.msra.mxu0 %v1276_v28 }
  0x6b   :  { %1204 = vmatprep.subr.bf16.mxu0 %v1277_v30  ;;  %1238 = vmatpush3.bf16.msra.mxu1 %v1277_v30 }
  0x6c   :  { %1231 = vmatprep.subr.bf16.mxu1 %v1278_v31 }
  0x6d   :  { %1157 = vmatmul.mubr.bf16.gmra.mxu0 %v1262_v29 }
  0x6e   :  { %1205 = vmatpush3.bf16.msra.mxu0 %v1277_v30 }
  0x6f   :  { %1206 = vmatprep.subr.bf16.mxu0 %v1278_v31  ;;  %1239 = vmatpush3.bf16.msra.mxu1 %v1278_v31 }
  0x72   :  { %1207 = vmatpush3.bf16.msra.mxu0 %v1278_v31 }
 0x112   :  { %v1178_v32 = vpop.f32.mrf.mxu1 }
 0x114   :  { %v513_v33 = vpop.f32.mrf.mxu1 }
 0x115   :  { %v1146_v56 = vpop.f32.mrf.mxu0 }
 0x116   :  { %v1179_v34 = vpop.f32.mrf.mxu1 }
 0x117   :  { %v628_v37 = vpack.c.bf16 %v1179_v34, %v1178_v32  ;;  %v275_v57 = vpop.f32.mrf.mxu0 }
 0x118   :  { %v516_v35 = vpop.f32.mrf.mxu1 }
 0x119   :  { %v627_v36 = vpack.c.bf16 %v516_v35, %v513_v33  ;;  %v1147_v58 = vpop.f32.mrf.mxu0 }
 0x11a   :  { %v1182_v38 = vpop.f32.mrf.mxu1 }
 0x11b   :  { %1208 = vmatprep.mubr.bf16.mxu0 %v627_v36  ;;  %v278_v59 = vpop.f32.mrf.mxu0 }
 0x11c   :  { %v529_v39 = vpop.f32.mrf.mxu1  ;;  %1209 = vmatmul.mubr.bf16.vlgmr.msra.gmra.mxu0 %v628_v37 }
 0x11d   :  { %v1150_v60 = vpop.f32.mrf.mxu0 }
 0x11e   :  { %v1183_v40 = vpop.f32.mrf.mxu1 }
 0x11f   :  { %v630_v43 = vpack.c.bf16 %v1183_v40, %v1182_v38  ;;  %v291_v61 = vpop.f32.mrf.mxu0 }
 0x120   :  { %v532_v41 = vpop.f32.mrf.mxu1 }
 0x121   :  { %v629_v42 = vpack.c.bf16 %v532_v41, %v529_v39  ;;  %v1151_v62 = vpop.f32.mrf.mxu0 }
 0x122   :  { %v1186_v44 = vpop.f32.mrf.mxu1 }
 0x123   :  { %1212 = vmatprep.mubr.bf16.mxu0 %v629_v42  ;;  %v294_v63 = vpop.f32.mrf.mxu0 }
 0x124   :  { %v545_v45 = vpop.f32.mrf.mxu1  ;;  %1213 = vmatmul.mubr.bf16.gmra.mxu0 %v630_v43 }
 0x125   :  { %v1154_v0 = vpop.f32.mrf.mxu0 }
 0x126   :  { %v1187_v46 = vpop.f32.mrf.mxu1 }
 0x127   :  { %v632_v49 = vpack.c.bf16 %v1187_v46, %v1186_v44  ;;  %v307_v1 = vpop.f32.mrf.mxu0 }
 0x128   :  { %v548_v47 = vpop.f32.mrf.mxu1 }
 0x129   :  { %v631_v48 = vpack.c.bf16 %v548_v47, %v545_v45  ;;  %v1155_v2 = vpop.f32.mrf.mxu0 }
 0x12a   :  { %v1190_v50 = vpop.f32.mrf.mxu1 }
 0x12b   :  { %1216 = vmatprep.mubr.bf16.mxu1 %v631_v48  ;;  %v310_v3 = vpop.f32.mrf.mxu0 }
 0x12c   :  { %v561_v51 = vpop.f32.mrf.mxu1  ;;  %1217 = vmatmul.mubr.bf16.vlgmr.msra.gmra.mxu1 %v632_v49 }
 0x12d   :  { %v1158_v4 = vpop.f32.mrf.mxu0 }
 0x12e   :  { %v1191_v52 = vpop.f32.mrf.mxu1 }
 0x12f   :  { %v634_v55 = vpack.c.bf16 %v1191_v52, %v1190_v50  ;;  %v1448_v5 = vpop.f32.mrf.mxu0 }
 0x130   :  { %v564_v53 = vpop.f32.mrf.mxu1 }
 0x131   :  { %v633_v54 = vpack.c.bf16 %v564_v53, %v561_v51  ;;  %v1450_v6 = vpop.f32.mrf.mxu0 }
 0x133   :  { %1220 = vmatprep.mubr.bf16.mxu1 %v633_v54  ;;  %v1452_v7 = vpop.f32.mrf.mxu0 }
 0x134   :  { %1221 = vmatmul.mubr.bf16.gmra.mxu1 %v634_v55 }
 0x1dc   :  { %v1210_v8 = vpop.f32.mrf.mxu0 }
 0x1dd   :  { %v814_v9 = vadd.f32 %v1210_v8, %v1146_v56 }
 0x1de   :  { %v733_v11 = vpop.f32.mrf.mxu0 }
 0x1df   :  { %v812_v12 = vadd.f32 %v733_v11, %v275_v57  ;;  %v837_v14 = vadd.f32 %v1457_v10, %v814_v9 }
 0x1e0   :  { %v1211_v13 = vpop.f32.mrf.mxu0 }
 0x1e1   :  { %v815_v15 = vadd.f32 %v1211_v13, %v1147_v58  ;;  %v835_v17 = vadd.f32 %v1457_v10, %v812_v12  ;;  %v853_v21 = vmax.f32 %v837_v14, 0.0 }
 0x1e2   :  { %v736_v16 = vpop.f32.mrf.mxu0 }
 0x1e3   :  { %v838_v18 = vadd.f32 %v1457_v10, %v815_v15  ;;  %v813_v19 = vadd.f32 %v736_v16, %v278_v59  ;;  %v851_v26 = vmax.f32 %v835_v17, 0.0 }
 0x1e4   :  { %v1214_v20 = vpop.f32.mrf.mxu0 }
 0x1e5   :  { %v854_v22 = vmax.f32 %v838_v18, 0.0  ;;  %v836_v23 = vadd.f32 %v1457_v10, %v813_v19  ;;  %v818_v24 = vadd.f32 %v1214_v20, %v1150_v60 }
 0x1e6   :  { %v749_v25 = vpop.f32.mrf.mxu0 }
 0x1e7   :  { %v1041_v27 = vpack.c.bf16 %v854_v22, %v853_v21  ;;  %v852_v28 = vmax.f32 %v836_v23, 0.0  ;;  %v816_v29 = vadd.f32 %v749_v25, %v291_v61  ;;  %v841_v32 = vadd.f32 %v1457_v10, %v818_v24 }
 0x1e8   :  { %v1215_v30 = vpop.f32.mrf.mxu0 }
 0x1e9   :  { %1073 = vst [vmem:[#allocation12 + $0x8] sm:$0xff] %v1041_v27   ;;  %v1036_v31 = vpack.c.bf16 %v852_v28, %v851_v26  ;;  %v819_v33 = vadd.f32 %v1215_v30, %v1151_v62  ;;  %v839_v35 = vadd.f32 %v1457_v10, %v816_v29  ;;  %v857_v39 = vmax.f32 %v841_v32, 0.0 }
 0x1ea   :  { %v752_v34 = vpop.f32.mrf.mxu0 }
 0x1eb   :  { %1037 = vst [vmem:[#allocation12] sm:$0xff] %v1036_v31   ;;  %v842_v36 = vadd.f32 %v1457_v10, %v819_v33  ;;  %v817_v37 = vadd.f32 %v752_v34, %v294_v63  ;;  %v855_v44 = vmax.f32 %v839_v35, 0.0 }
 0x1ec   :  { %v1218_v38 = vpop.f32.mrf.mxu1 }
 0x1ed   :  { %v858_v40 = vmax.f32 %v842_v36, 0.0  ;;  %v840_v41 = vadd.f32 %v1457_v10, %v817_v37  ;;  %v822_v42 = vadd.f32 %v1218_v38, %v1154_v0 }
 0x1ee   :  { %v765_v43 = vpop.f32.mrf.mxu1 }
 0x1ef   :  { %v1051_v45 = vpack.c.bf16 %v858_v40, %v857_v39  ;;  %v856_v46 = vmax.f32 %v840_v41, 0.0  ;;  %v820_v47 = vadd.f32 %v765_v43, %v307_v1  ;;  %v845_v50 = vadd.f32 %v1457_v10, %v822_v42 }
 0x1f0   :  { %v1219_v48 = vpop.f32.mrf.mxu1 }
 0x1f1   :  { %1075 = vst [vmem:[#allocation12 + $0x18] sm:$0xff] %v1051_v45   ;;  %v1046_v49 = vpack.c.bf16 %v856_v46, %v855_v44  ;;  %v823_v51 = vadd.f32 %v1219_v48, %v1155_v2  ;;  %v843_v53 = vadd.f32 %v1457_v10, %v820_v47  ;;  %v861_v57 = vmax.f32 %v845_v50, 0.0 }
 0x1f2   :  { %v768_v52 = vpop.f32.mrf.mxu1 }
 0x1f3   :  { %1074 = vst [vmem:[#allocation12 + $0x10] sm:$0xff] %v1046_v49   ;;  %v846_v54 = vadd.f32 %v1457_v10, %v823_v51  ;;  %v821_v55 = vadd.f32 %v768_v52, %v310_v3  ;;  %v859_v62 = vmax.f32 %v843_v53, 0.0 }
 0x1f4   :  { %v1222_v56 = vpop.f32.mrf.mxu1 }
 0x1f5   :  { %v862_v58 = vmax.f32 %v846_v54, 0.0  ;;  %v844_v59 = vadd.f32 %v1457_v10, %v821_v55  ;;  %v826_v60 = vadd.f32 %v1222_v56, %v1158_v4 }
 0x1f6   :  { %v781_v61 = vpop.f32.mrf.mxu1 }
 0x1f7   :  { %v1061_v63 = vpack.c.bf16 %v862_v58, %v861_v57  ;;  %v860_v0 = vmax.f32 %v844_v59, 0.0  ;;  %v824_v1 = vadd.f32 %v781_v61, %v1448_v5  ;;  %v849_v9 = vadd.f32 %v1457_v10, %v826_v60 }
 0x1f8   :  { %v1223_v2 = vpop.f32.mrf.mxu1 }
 0x1f9   :  { %1077 = vst [vmem:[#allocation12 + $0x28] sm:$0xff] %v1061_v63   ;;  %v1056_v8 = vpack.c.bf16 %v860_v0, %v859_v62  ;;  %v827_v11 = vadd.f32 %v1223_v2, %v1450_v6  ;;  %v847_v12 = vadd.f32 %v1457_v10, %v824_v1  ;;  %v865_v14 = vmax.f32 %v849_v9, 0.0 }
 0x1fa   :  { %v784_v3 = vpop.f32.mrf.mxu1 }
 0x1fb   :  { %1076 = vst [vmem:[#allocation12 + $0x20] sm:$0xff] %v1056_v8   ;;  %v850_v13 = vadd.f32 %v1457_v10, %v827_v11  ;;  %v825_v4 = vadd.f32 %v784_v3, %v1452_v7  ;;  %v863_v5 = vmax.f32 %v847_v12, 0.0 }
 0x1fd   :  { %v866_v15 = vmax.f32 %v850_v13, 0.0  ;;  %v848_v16 = vadd.f32 %v1457_v10, %v825_v4 }
 0x1ff   :  { %v1071_v17 = vpack.c.bf16 %v866_v15, %v865_v14  ;;  %v864_v18 = vmax.f32 %v848_v16, 0.0 }
 0x201   :  { %1079 = vst [vmem:[#allocation12 + $0x38] sm:$0xff] %v1071_v17   ;;  %v1066_v19 = vpack.c.bf16 %v864_v18, %v863_v5 }
 0x203   :  { %1078 = vst [vmem:[#allocation12 + $0x30] sm:$0xff] %v1066_v19  }
 0x204   :  { %1370 = shalt.err (!%p1367_p10)
}
 0x205   :  { %958 = dma.vmem_to_hbm [thread:$0]  %s953_s13, 1024, %s1489_s5, [#allocation6], %s1389_s23, %s1389_s23, %s1390_s24  }
 0x206   :  { %1385 = dma.done.wait [#allocation6], 1024  }
 0x207   :  { %1386 = vsyncadd [#allocation6], 4294966272 }
 0x208   :  { %962 = vsyncpa [#allocation5], 1 }
 0x209   :  { %963 = vsyncpa [#allocation8], 1 }
 0x20a   :  { %964 = vsyncpa [#allocation11], 1 }
 0x20b   :  { %965 = vsyncpa [#allocation6], 1 }

</bundles_post_ra>
